<compile_context>
chip_gen: v5e
topology: v5e:2x2
jax: 0.10.0
libtpu: 0.0.40
codegen_flags: <defaults>
</compile_context>

<pallas_src>
import functools

import jax
import jax.numpy as jnp
from jax.experimental import pallas as pl
from jax.experimental.pallas import tpu as pltpu


def _round_up(x, m):
    return (x + m - 1) // m * m


def _cdiv(a, b):
    return -(-a // b)


def _class_sum_kernel(x_ref, out_ref, acc_ref, *, tile_n, tiles_per_part, n_rows):
    """Streaming per-class (partial) sums over batch tiles.

    Grid: (parts, tiles_per_part). Each part accumulates its tiles into an
    (8, C) f32 VMEM accumulator and writes it to its own output block on the
    last tile. Ragged / duplicate (clamped) tiles are masked by global row id.
    """
    p = pl.program_id(0)
    t = pl.program_id(1)

    @pl.when(t == 0)
    def _():
        acc_ref[...] = jnp.zeros_like(acc_ref)

    # Global tile index and row mask (handles the ragged last tile and any
    # fully-out-of-range clamped duplicate tile).
    g = p * tiles_per_part + t
    row0 = g * tile_n
    rid = jax.lax.broadcasted_iota(jnp.int32, (tile_n, 1), 0) + row0
    valid = rid < n_rows                                   # (tile_n, 1)

    xv = x_ref[...]                                        # (tile_n, C) src dtype
    xm = jnp.where(valid, xv, jnp.zeros_like(xv))          # select, not mul (NaN-safe)

    # Fold rows in groups of 8 -> (8, C), cast fused into the reduction.
    # Sum over the leading (major) axis is elementwise VPU adds; the final
    # cross-sublane 8 -> 1 reduce is deferred to the JAX epilogue.
    folded = jnp.sum(xm.reshape(tile_n // 8, 8, xm.shape[-1]),
                     axis=0, dtype=jnp.float32)            # (8, C) f32
    acc_ref[...] += folded

    @pl.when(t == tiles_per_part - 1)
    def _():
        out_ref[...] = acc_ref[...]


def entropy_class_marginals(probs, *, max_tile_n=2048,
                            input_block_budget=12 * 2**20):
    """Pallas TPU implementation of EntropyClassMarginals.forward."""
    if probs.ndim == 3:
        n, m, c = probs.shape
        n_total = n * m
        flat = probs.reshape(n * m, c)        # free reshape (contiguous)
    elif probs.ndim == 2:
        n_total, c = probs.shape
        flat = probs
    else:
        raise ValueError(f"expected 2-D or 3-D probs, got {probs.ndim}-D")

    # ---- lane-dense packing for small class counts (free reshape) ----------
    pack_r = 1
    if c < 128:
        r = min(_cdiv(128, c), n_total)
        while r > 1 and n_total % r != 0:
            r -= 1
        pack_r = r
    n_rows = n_total // pack_r
    c_packed = c * pack_r
    x = flat.reshape(n_rows, c_packed)        # free: row-major contiguous

    # ---- tile size: dtype-granular, C-aware, VMEM-budgeted ------------------
    itemsize = x.dtype.itemsize
    granule = max(8, 32 // itemsize)          # 8 f32 / 16 bf16 / 32 int8-fp8
    c_lanes = _round_up(c_packed, 128)

    tile_cap = (input_block_budget // (2 * c_lanes * itemsize)) // granule * granule
    tile_cap = max(granule, tile_cap)
    tile_n = min(max_tile_n, tile_cap, _round_up(n_rows, granule))

    num_tiles = _cdiv(n_rows, tile_n)
    # Leading "parallel" axis: sharded across TensorCores on v7x (2 TC/chip),
    # a harmless sequential split on v5e/v6e.
    num_parts = 2 if num_tiles >= 2 else 1
    tiles_per_part = _cdiv(num_tiles, num_parts)

    kernel = functools.partial(_class_sum_kernel, tile_n=tile_n,
                               tiles_per_part=tiles_per_part, n_rows=n_rows)

    # Double-buffered input block + acc scratch + double-buffered output block.
    need = (2 * tile_n * c_lanes * itemsize
            + 8 * c_lanes * 4
            + 2 * 8 * c_lanes * 4)
    vmem_limit = int(max(32 * 2**20, need + (4 << 20)))

    cost = pl.CostEstimate(
        flops=n_rows * c_packed,
        transcendentals=0,
        bytes_accessed=n_rows * c_packed * itemsize + num_parts * 8 * c_packed * 4,
    )

    partial_sums = pl.pallas_call(
        kernel,
        out_shape=jax.ShapeDtypeStruct((num_parts * 8, c_packed), jnp.float32),
        grid=(num_parts, tiles_per_part),
        in_specs=[pl.BlockSpec(
            (tile_n, c_packed),
            # Clamp so overhang tiles (when num_tiles % num_parts != 0) re-read
            # the last in-bounds block; they are fully masked in-kernel.
            lambda p, t, _tpp=tiles_per_part, _nt=num_tiles: (
                jnp.minimum(p * _tpp + t, _nt - 1), 0))],
        out_specs=pl.BlockSpec((8, c_packed), lambda p, t: (p, 0)),
        scratch_shapes=[pltpu.VMEM((8, c_packed), jnp.float32)],
        compiler_params=pltpu.CompilerParams(
            dimension_semantics=("parallel", "arbitrary"),
            vmem_limit_bytes=vmem_limit),
        cost_estimate=cost,
    )(x)

    # ---- tiny JAX epilogue: fold partials, normalize, entropy ---------------
    sums = jnp.sum(partial_sums, axis=0)                   # (c_packed,)
    if pack_r > 1:
        sums = jnp.sum(sums.reshape(pack_r, c), axis=0)    # (c,)
    avg_p = sums / jnp.float32(n_total)
    return jnp.sum(avg_p * jnp.log(avg_p + jnp.float32(1e-8)))


def _reference(probs):
    """Pure-JAX reference mirroring the PyTorch forward."""
    probs = probs.astype(jnp.float32)
    if probs.ndim == 3:
        probs = jnp.mean(probs, axis=1)
    avg_p = jnp.mean(probs, axis=0)
    return jnp.sum(avg_p * jnp.log(avg_p + 1e-8))


if __name__ == "__main__":
    key = jax.random.PRNGKey(0)
    k1, k2, k3 = jax.random.split(key, 3)

    # 3-D case: (batch, n_views, classes) probabilities.
    probs3 = jax.nn.softmax(
        jax.random.normal(k1, (4, 3, 10), dtype=jnp.float32), axis=-1)
    # 2-D case: (batch, classes) probabilities.
    probs2 = jax.nn.softmax(
        jax.random.normal(k2, (8, 10), dtype=jnp.float32), axis=-1)
    # Ragged multi-tile, two-part case: exercises the in-kernel mask, the
    # clamped duplicate tile, and the lane-dense packing (C=96 -> R=2).
    probs_r = jax.nn.softmax(
        jax.random.normal(k3, (300, 96), dtype=jnp.float32), axis=-1)

    out3 = jax.block_until_ready(entropy_class_marginals(probs3))
    out2 = jax.block_until_ready(entropy_class_marginals(probs2))
    out_r = jax.block_until_ready(entropy_class_marginals(probs_r, max_tile_n=32))

    ref3, ref2, ref_r = _reference(probs3), _reference(probs2), _reference(probs_r)
    assert jnp.allclose(out3, ref3, rtol=1e-5, atol=1e-6), (out3, ref3)
    assert jnp.allclose(out2, ref2, rtol=1e-5, atol=1e-6), (out2, ref2)
    assert jnp.allclose(out_r, ref_r, rtol=1e-5, atol=1e-6), (out_r, ref_r)

    print("KERNEL_OK")
</pallas_src>

<mosaic_0001>
module attributes {stable_mosaic.version = 11 : i64} {
  func.func @_class_sum_kernel(%arg0: i32, %arg1: i32, %arg2: memref<8x120xf32, #tpu.memory_space<vmem>>, %arg3: memref<8x120xf32, #tpu.memory_space<vmem>>, %arg4: memref<8x120xf32, #tpu.memory_space<vmem>>) attributes {dimension_semantics = [#tpu.dimension_semantics<parallel>, #tpu.dimension_semantics<arbitrary>], iteration_bounds = array<i64: 1, 1>, scalar_prefetch = 0 : i64, scratch_operands = 1 : i64, tpu.core_type = #tpu.core_type<tc>, window_params = [{transform_indices = @transform_0, window_bounds = array<i64: 8, 120>}, {transform_indices = @transform_1, window_bounds = array<i64: 8, 120>}]} {
    %c0_i32 = arith.constant 0 : i32
    %0 = arith.cmpi eq, %arg1, %c0_i32 : i32
    %1 = arith.extui %0 : i1 to i32
    %c0_i32_0 = arith.constant 0 : i32
    %2 = arith.cmpi ne, %1, %c0_i32_0 : i32
    scf.if %2 {
      %cst_10 = arith.constant 0.000000e+00 : f32
      %24 = vector.broadcast %cst_10 : f32 to vector<8x120xf32>
      %c0_11 = arith.constant 0 : index
      %c0_12 = arith.constant 0 : index
      %25 = vector.load %arg4[%c0_11, %c0_12] : memref<8x120xf32, #tpu.memory_space<vmem>>, vector<8x120xf32>
      tpu.vector_store %arg4[%c0_11, %c0_12], %24 {strides = array<i32>} : memref<8x120xf32, #tpu.memory_space<vmem>>, vector<8x120xf32>,
    } else {
    }
    %c1_i32 = arith.constant 1 : i32
    %3 = arith.muli %arg0, %c1_i32 : i32
    %4 = arith.addi %3, %arg1 : i32
    %c8_i32 = arith.constant 8 : i32
    %5 = arith.muli %4, %c8_i32 : i32
    %6 = tpu.iota {dimensions = array<i32: 0>} : vector<8x1xi32>
    %7 = vector.broadcast %5 : i32 to vector<8x1xi32>
    %8 = arith.addi %6, %7 : vector<8x1xi32>
    %c1_i32_1 = arith.constant 1 : i32
    %9 = vector.broadcast %c1_i32_1 : i32 to vector<8x1xi32>
    %10 = arith.cmpi slt, %8, %9 : vector<8x1xi32>
    %c0 = arith.constant 0 : index
    %c0_2 = arith.constant 0 : index
    %11 = vector.load %arg2[%c0, %c0_2] : memref<8x120xf32, #tpu.memory_space<vmem>>, vector<8x120xf32>
    %cst = arith.constant 0.000000e+00 : f32
    %12 = vector.broadcast %cst : f32 to vector<8x120xf32>
    %13 = vector.shape_cast %10 : vector<8x1xi1> to vector<8x1xi1>
    %14 = vector.broadcast %13 : vector<8x1xi1> to vector<8x120xi1>
    %15 = arith.select %14, %11, %12 : vector<8x120xi1>, vector<8x120xf32>
    %16 = vector.shape_cast %15 : vector<8x120xf32> to vector<1x8x120xf32>
    %cst_3 = arith.constant dense<0.000000e+00> : vector<8x120xf32>
    %17 = vector.multi_reduction <add>, %16, %cst_3 [0] : vector<1x8x120xf32> to vector<8x120xf32>
    %c0_4 = arith.constant 0 : index
    %c0_5 = arith.constant 0 : index
    %18 = vector.load %arg4[%c0_4, %c0_5] : memref<8x120xf32, #tpu.memory_space<vmem>>, vector<8x120xf32>
    %19 = arith.addf %18, %17 : vector<8x120xf32>
    %c0_6 = arith.constant 0 : index
    %c0_7 = arith.constant 0 : index
    %20 = vector.load %arg4[%c0_6, %c0_7] : memref<8x120xf32, #tpu.memory_space<vmem>>, vector<8x120xf32>
    tpu.vector_store %arg4[%c0_6, %c0_7], %19 {strides = array<i32>} : memref<8x120xf32, #tpu.memory_space<vmem>>, vector<8x120xf32>,
    %c0_i32_8 = arith.constant 0 : i32
    %21 = arith.cmpi eq, %arg1, %c0_i32_8 : i32
    %22 = arith.extui %21 : i1 to i32
    %c0_i32_9 = arith.constant 0 : i32
    %23 = arith.cmpi ne, %22, %c0_i32_9 : i32
    scf.if %23 {
      %c0_10 = arith.constant 0 : index
      %c0_11 = arith.constant 0 : index
      %24 = vector.load %arg4[%c0_10, %c0_11] : memref<8x120xf32, #tpu.memory_space<vmem>>, vector<8x120xf32>
      %c0_12 = arith.constant 0 : index
      %c0_13 = arith.constant 0 : index
      %25 = vector.load %arg3[%c0_12, %c0_13] : memref<8x120xf32, #tpu.memory_space<vmem>>, vector<8x120xf32>
      tpu.vector_store %arg3[%c0_12, %c0_13], %24 {strides = array<i32>} : memref<8x120xf32, #tpu.memory_space<vmem>>, vector<8x120xf32>,
    } else {
    }
    return
  }
  func.func @transform_0(%arg0: i32, %arg1: i32) -> (i32, i32) {
    %c1_i32 = arith.constant 1 : i32
    %0 = arith.muli %arg0, %c1_i32 : i32
    %1 = arith.addi %0, %arg1 : i32
    %c0_i32 = arith.constant 0 : i32
    %2 = arith.minsi %1, %c0_i32 : i32
    %c0_i32_0 = arith.constant 0 : i32
    %c0_i32_1 = arith.constant 0 : i32
    return %2, %c0_i32_0 : i32, i32
  }
  func.func @transform_1(%arg0: i32, %arg1: i32) -> (i32, i32) {
    %c0_i32 = arith.constant 0 : i32
    %c0_i32_0 = arith.constant 0 : i32
    return %arg0, %c0_i32 : i32, i32
  }
}

</mosaic_0001>

<bundles_post_ra>
// kernel: tpu_custom_call.1
= control target key start
LH: loop header
LB: loop body
LE: loop exit
PB: predicated region body
PF: predicated region fallthrough
CT: control target
= control target key end

     0   :  { %6 = vsyncpa [#allocation4], 0  ;;  %s163_s0 = inlined_call_operand.hbm [shape: f32[1,120], index: 0, kind: input, shape index: {}]   ;;  %s164_s1 = inlined_call_operand.hbm [shape: f32[8,120], index: 1, kind: output, shape index: {}]  }
   0x1   :  { %7 = vsyncpa [#allocation5], 0 }
   0x2   :  { %17 = vsyncadd [#allocation4], 112  ;;  %s20_s8 = sshll.u32 %s163_s0, 4  ;;  %s142_s9 = smov [#allocation3]   ;;  %s21_s8 = int_to_ptr.hbm [resolvable:$true] %s20_s8 }
   0x3   :  { %s22_s10 = sshll.u32 %s142_s9, 4  ;;  %s143_s11 = smov 16   ;;  %s23_s10 = int_to_ptr.vmem [resolvable:$true] %s22_s10 }
   0x4   :  { %s144_s12 = smov 1  }
   0x5   :  { %28 = dma.hbm_to_vmem [thread:$0]  %s21_s8, 16, %s23_s10, [#allocation4], %s143_s11, %s143_s11, %s144_s12  }
   0x6   :  { %138 = dma.done.wait [#allocation4], 128  }
   0x7   :  { %139 = vsyncadd [#allocation4], 4294967168  ;;  %vm42_vm0 = vcmask 982016   ;;  %v145_v0 = vmov 0.0   ;;  %v84_v1 = vld [vmem:[#allocation3] sm:$0x1] }
   0x8   :  { %43 = vst.msk [vmem:[#allocation2] sm:$0xff] %vm42_vm0, %v145_v0  ;;  %s146_s13 = smov [#allocation6]   ;;  %s72_s16 = sshll.u32 %s164_s1, 4  ;;  %s73_s16 = int_to_ptr.hbm [resolvable:$true] %s72_s16 }
   0x9   :  { %s70_s14 = sshll.u32 %s146_s13, 4  ;;  %s71_s14 = int_to_ptr.vmem [resolvable:$true] %s70_s14 }
   0xf   :  { %v56_v2 = vld [vmem:[#allocation2] sm:$0xff] }
  0x10   :  { %v57_v3 = vadd.f32 %v84_v1, %v56_v2 }
  0x12   :  { %59 = vst.msk [vmem:[#allocation2] sm:$0xff] %vm42_vm0, %v57_v3 }
  0x19   :  { %v63_v4 = vld [vmem:[#allocation2] sm:$0xff] }
  0x1a   :  { %64 = vst.msk [vmem:[#allocation6] sm:$0xff] %vm42_vm0, %v63_v4 }
  0x1b   :  { %75 = dma.vmem_to_hbm [thread:$0]  %s71_s14, 128, %s73_s16, [#allocation5]  }
  0x1c   :  { %140 = dma.done.wait [#allocation5], 128  }
  0x1d   :  { %141 = vsyncadd [#allocation5], 4294967168 }
  0x1e   :  { %80 = vsyncpa [#allocation4], 1 }
  0x1f   :  { %81 = vsyncpa [#allocation5], 1 }

</bundles_post_ra>
